<compile_context>
chip_gen: v7x
topology: tpu7x:2x2x1
jax: 0.10.0
libtpu: 0.0.40
codegen_flags: <defaults>
</compile_context>

<pallas_src>
import functools
import math

import jax
import jax.numpy as jnp
from jax.experimental import pallas as pl
from jax.experimental.pallas import tpu as pltpu


def _round_up(x, m):
    return (x + m - 1) // m * m


def _embed_gather_kernel(ids_ref, emb_hbm, out_ref, rows, sem, *,
                         token_tile, sqrt_d):
    """Double-buffered embedding-row gather from HBM, scale, store.

    ids_ref : (n_pad,) int32 in SMEM (scalar prefetch)
    emb_hbm : (vocab, d_model) ref left in HBM (no auto-DMA)
    out_ref : (token_tile, d_model) VMEM output tile (auto-pipelined writeback)
    rows    : (2, token_tile, d_model) VMEM gather landing buffers
    sem     : (2,) DMA semaphores, one per buffer slot
    """
    i = pl.program_id(0)
    n_steps = pl.num_programs(0)

    def issue_tile(step, slot):
        base = step * token_tile

        @pl.loop(0, token_tile)
        def _issue(r):
            tok = ids_ref[base + r]                  # scalar read from SMEM
            pltpu.make_async_copy(
                emb_hbm.at[pl.ds(tok, 1), :],
                rows.at[slot, pl.ds(r, 1), :],
                sem.at[slot],
            ).start()

    # Prime the pipeline: gathers for tile 0 go into slot 0.
    @pl.when(i == 0)
    def _():
        issue_tile(0, 0)

    # Prefetch next tile's rows into the other slot; these DMAs overlap with
    # this tile's waits, scale pass and output writeback.
    @pl.when(i + 1 < n_steps)
    def _():
        issue_tile(i + 1, (i + 1) & 1)

    slot = i & 1

    # Wait for all row gathers of the current tile.  Every copy has the same
    # size and signals the same semaphore, and nothing is read until all waits
    # retire, so completion order does not matter.
    @pl.loop(0, token_tile)
    def _wait(r):
        pltpu.make_async_copy(
            emb_hbm.at[pl.ds(0, 1), :],
            rows.at[slot, pl.ds(r, 1), :],
            sem.at[slot],
        ).wait()

    # Single VPU pass: scale by sqrt(d_model) and write the output tile.
    out_ref[...] = (rows[slot] * sqrt_d).astype(out_ref.dtype)


def input_embeddings(x, emb_table, *, token_tile=128):
    """x: (batch, seq) integer token ids; emb_table: (vocab, d_model).

    Returns (batch, seq, d_model) = emb_table[x] * sqrt(d_model), matching
    `InputEmbeddings.forward`.
    """
    batch, seq = x.shape
    vocab, d_model = emb_table.shape
    n = batch * seq

    # Tokens per grid step: multiple of 8 (sublane), no larger than needed.
    tile = _round_up(max(8, min(int(token_tile), n)), 8)
    n_pad = _round_up(n, tile)

    ids = x.reshape(n).astype(jnp.int32)
    if n_pad != n:
        # Pad with id 0 (always in range); padded rows are sliced off below.
        ids = jnp.concatenate([ids, jnp.zeros((n_pad - n,), jnp.int32)])

    # NOTE: an out-of-range token id trips the DMA bounds check rather than the
    # Python IndexError nn.Embedding raises.
    kernel = functools.partial(
        _embed_gather_kernel, token_tile=tile, sqrt_d=float(math.sqrt(d_model)))

    out_flat = pl.pallas_call(
        kernel,
        out_shape=jax.ShapeDtypeStruct((n_pad, d_model), emb_table.dtype),
        grid_spec=pltpu.PrefetchScalarGridSpec(
            num_scalar_prefetch=1,                   # ids -> SMEM
            grid=(n_pad // tile,),
            in_specs=[
                pl.BlockSpec(memory_space=pl.ANY),   # table stays in HBM
            ],
            out_specs=pl.BlockSpec((tile, d_model), lambda i, ids: (i, 0)),
            scratch_shapes=[
                pltpu.VMEM((2, tile, d_model), emb_table.dtype),
                pltpu.SemaphoreType.DMA((2,)),
            ],
        ),
        # Manual cross-step prefetch carries state between grid iterations, so
        # the grid axis must execute sequentially.
        compiler_params=pltpu.CompilerParams(
            dimension_semantics=("arbitrary",)),
    )(ids, emb_table)

    return out_flat[:n].reshape(batch, seq, d_model)


if __name__ == "__main__":
    # Small shapes consistent with the module's forward.
    d_model = 128
    vocab_size = 512
    batch, seq = 2, 8

    key = jax.random.PRNGKey(0)
    k_emb, k_ids = jax.random.split(key)

    # nn.Embedding default init: N(0, 1)
    emb_table = jax.random.normal(k_emb, (vocab_size, d_model), dtype=jnp.float32)
    x = jax.random.randint(k_ids, (batch, seq), 0, vocab_size, dtype=jnp.int32)

    out = jax.block_until_ready(input_embeddings(x, emb_table))
    ref = jnp.take(emb_table, x, axis=0) * jnp.float32(math.sqrt(d_model))
    assert out.shape == (batch, seq, d_model)
    assert out.dtype == jnp.float32
    assert jnp.allclose(out, ref, atol=1e-5, rtol=1e-5)

    # Second check: multi-step grid (exercises the double-buffered prefetch)
    # plus a ragged tail (n = 300, tile = 128 -> 3 grid steps, 84 padded rows).
    b2, s2 = 3, 100
    x2 = jax.random.randint(jax.random.PRNGKey(1), (b2, s2), 0, vocab_size,
                            dtype=jnp.int32)
    out2 = jax.block_until_ready(input_embeddings(x2, emb_table, token_tile=128))
    ref2 = jnp.take(emb_table, x2, axis=0) * jnp.float32(math.sqrt(d_model))
    assert out2.shape == (b2, s2, d_model)
    assert jnp.allclose(out2, ref2, atol=1e-5, rtol=1e-5)

    print("KERNEL_OK")
</pallas_src>

<mosaic_0001>
module attributes {stable_mosaic.version = 11 : i64} {
  func.func @_embed_gather_kernel(%arg0: i32, %arg1: memref<16xi32, #tpu.memory_space<smem>>, %arg2: memref<512x128xf32, #tpu.memory_space<any>>, %arg3: memref<16x128xf32, #tpu.memory_space<vmem>>, %arg4: memref<2x16x128xf32, #tpu.memory_space<vmem>>, %arg5: memref<2x!tpu.dma_semaphore, #tpu.memory_space<semaphore_mem>>) attributes {dimension_semantics = [#tpu.dimension_semantics<arbitrary>], iteration_bounds = array<i64: 1>, scalar_prefetch = 1 : i64, scratch_operands = 2 : i64, tpu.core_type = #tpu.core_type<tc>, window_params = [{}, {transform_indices = @transform_1, window_bounds = array<i64: 16, 128>}]} {
    %c0_i32 = arith.constant 0 : i32
    %0 = arith.cmpi eq, %arg0, %c0_i32 : i32
    %1 = arith.extui %0 : i1 to i32
    %c0_i32_0 = arith.constant 0 : i32
    %2 = arith.cmpi ne, %1, %c0_i32_0 : i32
    scf.if %2 {
      %c0_i32_10 = arith.constant 0 : i32
      %c16_i32_11 = arith.constant 16 : i32
      %15 = arith.addi %c0_i32_10, %c16_i32_11 : i32
      %c1_i32_12 = arith.constant 1 : i32
      scf.for %arg6 = %c0_i32_10 to %15 step %c1_i32_12  : i32 {
        %c1_i32_14 = arith.constant 1 : i32
        %16 = arith.muli %arg6, %c1_i32_14 : i32
        %c0_i32_15 = arith.constant 0 : i32
        %17 = arith.addi %c0_i32_15, %16 : i32
        %c0_i32_16 = arith.constant 0 : i32
        %18 = arith.addi %c0_i32_16, %17 : i32
        %19 = arith.index_cast %18 : i32 to index
        %20 = memref.load %arg1[%19] : memref<16xi32, #tpu.memory_space<smem>>
        %c0_i32_17 = arith.constant 0 : i32
        %c0_i32_18 = arith.constant 0 : i32
        %c0_i32_19 = arith.constant 0 : i32
        %21 = tpu.memref_slice %arg2[%20, %c0_i32_19] : memref<512x128xf32, #tpu.memory_space<any>> -> memref<1x128xf32, #tpu.memory_space<any>>
        %c0_i32_20 = arith.constant 0 : i32
        %22 = tpu.memref_slice %arg4[%c0_i32_17, %17, %c0_i32_20] : memref<2x16x128xf32, #tpu.memory_space<vmem>> -> memref<1x1x128xf32, #tpu.memory_space<vmem>>
        %23 = tpu.memref_squeeze %22 : memref<1x1x128xf32, #tpu.memory_space<vmem>> -> memref<1x128xf32, #tpu.memory_space<vmem>>
        %24 = tpu.memref_slice %arg5[%c0_i32_18] : memref<2x!tpu.dma_semaphore, #tpu.memory_space<semaphore_mem>> -> memref<1x!tpu.dma_semaphore, #tpu.memory_space<semaphore_mem>>
        %25 = tpu.memref_squeeze %24 : memref<1x!tpu.dma_semaphore, #tpu.memory_space<semaphore_mem>> -> memref<!tpu.dma_semaphore, #tpu.memory_space<semaphore_mem>>
        tpu.enqueue_dma source(%21 : memref<1x128xf32, #tpu.memory_space<any>>) target(%23 : memref<1x128xf32, #tpu.memory_space<vmem>>) target_semaphore(%25 : memref<!tpu.dma_semaphore, #tpu.memory_space<semaphore_mem>>)
      }
      %c16_i32_13 = arith.constant 16 : i32
    } else {
    }
    %c1_i32 = arith.constant 1 : i32
    %3 = arith.addi %arg0, %c1_i32 : i32
    %c1_i32_1 = arith.constant 1 : i32
    %4 = arith.cmpi slt, %3, %c1_i32_1 : i32
    %5 = arith.extui %4 : i1 to i32
    %c0_i32_2 = arith.constant 0 : i32
    %6 = arith.cmpi ne, %5, %c0_i32_2 : i32
    scf.if %6 {
      %c1_i32_10 = arith.constant 1 : i32
      %15 = arith.addi %arg0, %c1_i32_10 : i32
      %c1_i32_11 = arith.constant 1 : i32
      %16 = arith.addi %arg0, %c1_i32_11 : i32
      %c1_i32_12 = arith.constant 1 : i32
      %17 = arith.andi %16, %c1_i32_12 : i32
      %c16_i32_13 = arith.constant 16 : i32
      %18 = arith.muli %15, %c16_i32_13 : i32
      %c0_i32_14 = arith.constant 0 : i32
      %c16_i32_15 = arith.constant 16 : i32
      %19 = arith.addi %c0_i32_14, %c16_i32_15 : i32
      %c1_i32_16 = arith.constant 1 : i32
      scf.for %arg6 = %c0_i32_14 to %19 step %c1_i32_16  : i32 {
        %c1_i32_18 = arith.constant 1 : i32
        %20 = arith.muli %arg6, %c1_i32_18 : i32
        %c0_i32_19 = arith.constant 0 : i32
        %21 = arith.addi %c0_i32_19, %20 : i32
        %22 = arith.addi %18, %21 : i32
        %23 = arith.index_cast %22 : i32 to index
        %24 = memref.load %arg1[%23] : memref<16xi32, #tpu.memory_space<smem>>
        %c0_i32_20 = arith.constant 0 : i32
        %25 = tpu.memref_slice %arg2[%24, %c0_i32_20] : memref<512x128xf32, #tpu.memory_space<any>> -> memref<1x128xf32, #tpu.memory_space<any>>
        %c0_i32_21 = arith.constant 0 : i32
        %26 = tpu.memref_slice %arg4[%17, %21, %c0_i32_21] : memref<2x16x128xf32, #tpu.memory_space<vmem>> -> memref<1x1x128xf32, #tpu.memory_space<vmem>>
        %27 = tpu.memref_squeeze %26 : memref<1x1x128xf32, #tpu.memory_space<vmem>> -> memref<1x128xf32, #tpu.memory_space<vmem>>
        %28 = tpu.memref_slice %arg5[%17] : memref<2x!tpu.dma_semaphore, #tpu.memory_space<semaphore_mem>> -> memref<1x!tpu.dma_semaphore, #tpu.memory_space<semaphore_mem>>
        %29 = tpu.memref_squeeze %28 : memref<1x!tpu.dma_semaphore, #tpu.memory_space<semaphore_mem>> -> memref<!tpu.dma_semaphore, #tpu.memory_space<semaphore_mem>>
        tpu.enqueue_dma source(%25 : memref<1x128xf32, #tpu.memory_space<any>>) target(%27 : memref<1x128xf32, #tpu.memory_space<vmem>>) target_semaphore(%29 : memref<!tpu.dma_semaphore, #tpu.memory_space<semaphore_mem>>)
      }
      %c16_i32_17 = arith.constant 16 : i32
    } else {
    }
    %c1_i32_3 = arith.constant 1 : i32
    %7 = arith.andi %arg0, %c1_i32_3 : i32
    %c0_i32_4 = arith.constant 0 : i32
    %c16_i32 = arith.constant 16 : i32
    %8 = arith.addi %c0_i32_4, %c16_i32 : i32
    %c1_i32_5 = arith.constant 1 : i32
    scf.for %arg6 = %c0_i32_4 to %8 step %c1_i32_5  : i32 {
      %c1_i32_10 = arith.constant 1 : i32
      %15 = arith.muli %arg6, %c1_i32_10 : i32
      %c0_i32_11 = arith.constant 0 : i32
      %16 = arith.addi %c0_i32_11, %15 : i32
      %c0_i32_12 = arith.constant 0 : i32
      %c0_i32_13 = arith.constant 0 : i32
      %17 = tpu.memref_slice %arg2[%c0_i32_12, %c0_i32_13] : memref<512x128xf32, #tpu.memory_space<any>> -> memref<1x128xf32, #tpu.memory_space<any>>
      %c0_i32_14 = arith.constant 0 : i32
      %18 = tpu.memref_slice %arg4[%7, %16, %c0_i32_14] : memref<2x16x128xf32, #tpu.memory_space<vmem>> -> memref<1x1x128xf32, #tpu.memory_space<vmem>>
      %19 = tpu.memref_squeeze %18 : memref<1x1x128xf32, #tpu.memory_space<vmem>> -> memref<1x128xf32, #tpu.memory_space<vmem>>
      %20 = tpu.memref_slice %arg5[%7] : memref<2x!tpu.dma_semaphore, #tpu.memory_space<semaphore_mem>> -> memref<1x!tpu.dma_semaphore, #tpu.memory_space<semaphore_mem>>
      %21 = tpu.memref_squeeze %20 : memref<1x!tpu.dma_semaphore, #tpu.memory_space<semaphore_mem>> -> memref<!tpu.dma_semaphore, #tpu.memory_space<semaphore_mem>>
      tpu.wait_dma2 semaphore(%21 : memref<!tpu.dma_semaphore, #tpu.memory_space<semaphore_mem>>) src(%17 : memref<1x128xf32, #tpu.memory_space<any>>) dst(%19 : memref<1x128xf32, #tpu.memory_space<vmem>>)
    }
    %c16_i32_6 = arith.constant 16 : i32
    %9 = arith.index_cast %7 : i32 to index
    %c0 = arith.constant 0 : index
    %c0_7 = arith.constant 0 : index
    %10 = vector.load %arg4[%9, %c0, %c0_7] : memref<2x16x128xf32, #tpu.memory_space<vmem>>, vector<1x16x128xf32>
    %11 = vector.shape_cast %10 : vector<1x16x128xf32> to vector<16x128xf32>
    %cst = arith.constant 11.3137083 : f32
    %12 = vector.broadcast %cst : f32 to vector<16x128xf32>
    %13 = arith.mulf %11, %12 : vector<16x128xf32>
    %c0_8 = arith.constant 0 : index
    %c0_9 = arith.constant 0 : index
    %14 = vector.load %arg3[%c0_8, %c0_9] : memref<16x128xf32, #tpu.memory_space<vmem>>, vector<16x128xf32>
    tpu.vector_store %arg3[%c0_8, %c0_9], %13 {strides = array<i32>} : memref<16x128xf32, #tpu.memory_space<vmem>>, vector<16x128xf32>,
    return
  }
  func.func @transform_1(%arg0: i32, %arg1: memref<16xi32, #tpu.memory_space<smem>>) -> (i32, i32) {
    %c0_i32 = arith.constant 0 : i32
    %c0_i32_0 = arith.constant 0 : i32
    return %arg0, %c0_i32 : i32, i32
  }
}

</mosaic_0001>

<bundles_post_ra>
// kernel: tpu_custom_call.1
= control target key start
LH: loop header
LB: loop body
LE: loop exit
PB: predicated region body
PF: predicated region fallthrough
CT: control target
= control target key end

     0   :  { %s312_s0 = inlined_call_operand.hbm [shape: s32[16], index: 0, kind: input, shape index: {}]   ;;  %s313_s1 = inlined_call_operand.hbm [shape: f32[512,128], index: 1, kind: input, shape index: {}]   ;;  %s314_s2 = inlined_call_operand.hbm [shape: f32[16,128], index: 2, kind: output, shape index: {}]  }
   0x1   :  { %s171_s11 = scalar_lea.hbm %s312_s0, 16 }
   0x2   :  { %p172_p0 = scmp.ne.s32.totalorder %s312_s0, %s171_s11  ;;  %p175_p1 = scmp.lt.u32.totalorder %s171_s11, %s312_s0 }
   0x4   :  { %p177_p2 = pnand %p175_p1, %p172_p0 }
   0x6   :  { %180 = shalt.err (!%p177_p2)  }
   0x7   :  { %s249_s16 = smov [#allocation5]  }
   0x8   :  { %8 = dma.hbm_to_smem %s312_s0, 16, %s249_s16, [#allocation4] }
   0x9   :  { %235 = dma.done.wait [#allocation4], 16 }
   0xa   :  { %236 = vsyncadd [#allocation4], 4294967280 }
   0xb   :  { %10 = sfence }
   0xc   :  { %11 = vsyncpa [#allocation7], 0  ;;  %s281_s19 = smov 0  }
   0xd LB: > { %s22_s20 = sld [smem:[#allocation5 + %s243_s19]]  ;;  %s25_s21 = scalar_lea.vmem [#allocation2], %s243_s19  ;;  %s243_s19 = sphi %s281_s19, %s21_s19  }
   0xe   : > { %s33_s22 = sshll.u32 %s25_s21, 4  ;;  %s183_s29 = scalar_lea.hbm %s313_s1, 8192  ;;  %s34_s22 = int_to_ptr.vmem [resolvable:$true] %s33_s22 }
  0x13   : > { %s144_s23 = sshll.u32 %s22_s20, 4 }
  0x14   : > { %s24_s25 = scalar_lea.hbm %s313_s1, %s144_s23 }
  0x15   : > { %s181_s26 = scalar_lea.hbm %s24_s25, 16  ;;  %p184_p4 = scmp.lt.u32.totalorder %s24_s25, %s313_s1 }
  0x16   : > { %p182_p3 = scmp.ne.s32.totalorder %s24_s25, %s181_s26  ;;  %p185_p5 = scmp.lt.u32.totalorder %s183_s29, %s181_s26 }
  0x17   : > { %p187_p7 = scmp.lt.u32.totalorder %s181_s26, %s24_s25 }
  0x18   : > { %p186_p6 = por %p185_p5, %p184_p4 }
  0x1a   : > { %p188_p8 = por %p187_p7, %p186_p6 }
  0x1c   : > { %p189_p9 = pnand %p188_p8, %p182_p3 }
  0x1e   : > { %192 = shalt.err (!%p189_p9)  }
  0x1f   : > { %s193_s4 = scalar_lea.vmem %s34_s22, 16  ;;  %s250_s5 = smov [#allocation2]  }
  0x20   : > { %p194_p10 = scmp.ne.s32.totalorder %s34_s22, %s193_s4  ;;  %s195_s6 = sshll.u32 %s250_s5, 4  ;;  %s196_s6 = int_to_ptr.vmem [resolvable:$false] %s195_s6 }
  0x21   : > { %s197_s7 = scalar_lea.vmem %s196_s6, 512  ;;  %p198_p11 = scmp.lt.s32.totalorder %s34_s22, %s196_s6 }
  0x22   : > { %p199_p12 = scmp.lt.s32.totalorder %s197_s7, %s193_s4 }
  0x24   : > { %p200_p13 = por %p199_p12, %p198_p11 }
  0x26   : > { %p201_p0 = pnand %p200_p13, %p194_p10 }
  0x28   : > { %204 = shalt.err (!%p201_p0)  }
  0x29   : > { %36 = dma.hbm_to_vmem [thread:$0]  %s24_s25, 16, %s34_s22, [#allocation3] }
  0x2a   : > { %s21_s19 = sadd.s32 1, %s243_s19  }
  0x2b   : > { %p18_p1 = scmp.ge.s32.totalorder %s21_s19, 16  }
  0x2c   :  { %s245_s8 = smov (%p18_p1), 0  }
  0x2d   :  { %20 = sbr.rel (!%p18_p1) target bundleno = 13 (0xd), region = 65 }
  0x34 LB: > { %237 = dma.done.wait [#allocation3], 16  ;;  %s247_s8 = sphi %s245_s8, %s75_s8  }
  0x35   : > { %238 = vsyncadd [#allocation3], 4294967280  ;;  %s75_s8 = sadd.s32 1, %s247_s8  }
  0x36   : > { %p72_p2 = scmp.ge.s32.totalorder %s75_s8, 16  }
  0x37   :  { %v82_v0 = vld [vmem:[#allocation2] sm:$0xff] (%p72_p2)  ;;  %v83_v1 = vld [vmem:[#allocation2 + $0x8] sm:$0xff] (%p72_p2)  ;;  %s251_s9 = smov (%p72_p2), [#allocation6]  }
  0x38   :  { %74 = sbr.rel (!%p72_p2) target bundleno = 52 (0x34), region = 87  ;;  %v84_v2 = vmul.f32 (%p72_p2), 11.313708, %v82_v0  ;;  %v85_v3 = vmul.f32 (%p72_p2), 11.313708, %v83_v1  ;;  %s93_s10 = sshll.u32 (%p72_p2), %s251_s9, 4  ;;  %s94_s10 = int_to_ptr.vmem [resolvable:$true] %s93_s10 }
  0x39   :  { %s205_s11 = scalar_lea.vmem (%p72_p2), %s94_s10, 256  ;;  %p210_p4 = scmp.lt.s32.totalorder (%p72_p2), %s94_s10, %s94_s10 }
  0x3a   :  { %86 = vst [vmem:[#allocation6] sm:$0xff] (%p72_p2), %v84_v2  ;;  %87 = vst [vmem:[#allocation6 + $0x8] sm:$0xff] (%p72_p2), %v85_v3  ;;  %p206_p3 = scmp.ne.s32.totalorder (%p72_p2), %s94_s10, %s205_s11  ;;  %p211_p5 = scmp.lt.s32.totalorder (%p72_p2), %s205_s11, %s205_s11 }
  0x3c   :  { %p212_p6 = por (%p72_p2), %p211_p5, %p210_p4 }
  0x3e   :  { %p213_p7 = pnand (%p72_p2), %p212_p6, %p206_p3 }
  0x40   :  { %216 = shalt.err (!%p213_p7)
}
  0x41   :  { %s217_s13 = scalar_lea.hbm %s314_s2, 256 }
  0x42   :  { %p218_p8 = scmp.ne.s32.totalorder %s314_s2, %s217_s13  ;;  %p221_p9 = scmp.lt.u32.totalorder %s217_s13, %s314_s2 }
  0x44   :  { %p223_p10 = pnand %p221_p9, %p218_p8 }
  0x46   :  { %226 = shalt.err (!%p223_p10)
}
  0x47   :  { %s252_s18 = smov 128   ;;  %s253_s19 = smov 8  }
  0x48   :  { %99 = dma.vmem_to_hbm [thread:$0]  %s94_s10, 256, %s314_s2, [#allocation7], %s252_s18, %s252_s18, %s253_s19  }
  0x49   :  { %239 = dma.done.wait [#allocation7], 256  }
  0x4a   :  { %240 = vsyncadd [#allocation7], 4294967040 }
  0x4b   :  { %103 = vsyncpa [#allocation7], 1 }
  0x4c   :  { %104 = vsyncmov [#allocation3] }
  0x4f   :  { %s105_s22 = vpop.sfrf %104 }
  0x50   :  { %p147_p11 = scmp.ne.s32.totalorder %s105_s22, 0 }
  0x52   :  { %109 = shalt.err (%p147_p11)  }
  0x53   :  { %111 = vsyncmov [#allocation3 + $0x1] }
  0x56   :  { %s112_s23 = vpop.sfrf %111 }
  0x57   :  { %p148_p12 = scmp.ne.s32.totalorder %s112_s23, 0 }
  0x59   :  { %116 = shalt.err (%p148_p12)  }

</bundles_post_ra>
